<compile_context>
chip_gen: v7x
topology: tpu7x:2x2x1
jax: 0.10.0
libtpu: 0.0.40
codegen_flags: <defaults>
</compile_context>

<pallas_src>
import functools

import jax
import jax.numpy as jnp
from jax.experimental import pallas as pl
from jax.experimental.pallas import tpu as pltpu

_BN_EPS = 1e-5
_VMEM_LIMIT_BYTES = 48 * 1024 * 1024   # scoped-VMEM cap; safe on v5e/v6e/v7x
_VMEM_BUDGET_BYTES = 40 * 1024 * 1024  # tile-footprint budget (headroom under the cap)


def _round_up(v, m):
    return (v + m - 1) // m * m


def _sublane(dtype):
    # rows per sublane tile: f32 -> 8, bf16 -> 16, int8/fp8 -> 32
    return 8 * (4 // jnp.dtype(dtype).itemsize)


def _clamp_tm(tm_target, m, per_row_bytes, fixed_bytes, sub):
    """Largest row-tile <= tm_target (and <= M rounded up) fitting the VMEM budget."""
    tm = min(tm_target, _round_up(m, sub))
    avail = max(_VMEM_BUDGET_BYTES - fixed_bytes, per_row_bytes * sub)
    tm_max = max(sub, (avail // max(per_row_bytes, 1)) // sub * sub)
    return max(sub, min(tm, tm_max))


def _stats_kernel(x_ref, w_ref, g_ref, b_ref, scale_ref, shift_ref,
                  sum_ref, ssq_ref, *, m_total, tm, eps):
    """Phase 1: per-channel sum / sum-of-squares -> (scale, shift)."""
    k = pl.program_id(0)  # M tiles (reduction axis)

    @pl.when(k == 0)
    def _():
        sum_ref[...] = jnp.zeros_like(sum_ref)
        ssq_ref[...] = jnp.zeros_like(ssq_ref)

    x = x_ref[...]
    if m_total % tm != 0:  # static: mask only when a padded (partial) tile exists
        rows = k * tm + jax.lax.broadcasted_iota(jnp.int32, (tm, 1), 0)
        x = jnp.where(rows < m_total, x, jnp.zeros_like(x))

    # MXU matmul in the streamed dtype (bf16 inputs -> 2x throughput), f32 accumulation.
    y = jnp.dot(x, w_ref[...], preferred_element_type=jnp.float32)  # (tm, Cout)

    sum_ref[...] += jnp.sum(y, axis=0, keepdims=True)
    ssq_ref[...] += jnp.sum(y * y, axis=0, keepdims=True)

    @pl.when(k == pl.num_programs(0) - 1)
    def _():
        inv_m = 1.0 / float(m_total)
        mean = sum_ref[...] * inv_m
        # Biased variance via E[y^2] - mean^2 (PyTorch BN normalizes with biased var).
        var = jnp.maximum(ssq_ref[...] * inv_m - mean * mean, 0.0)
        inv_std = jax.lax.rsqrt(var + eps)          # EUP, once per channel
        scale = g_ref[...].astype(jnp.float32) * inv_std
        scale_ref[...] = scale
        shift_ref[...] = b_ref[...].astype(jnp.float32) - mean * scale


def _normalize_kernel(x_ref, w_ref, scale_ref, shift_ref, o_ref):
    """Phase 2: recompute matmul tile, fused affine + ReLU."""
    y = jnp.dot(x_ref[...], w_ref[...], preferred_element_type=jnp.float32)
    out = y * scale_ref[...] + shift_ref[...]
    # NOTE: rows past M in the last partial tile are garbage; Pallas drops the
    # out-of-bounds output rows on store (do not remove this reliance silently).
    o_ref[...] = jnp.maximum(out, 0.0).astype(o_ref.dtype)


def transition_down(pxo, weight_t, gamma, beta, *, stride=1, nsample=16,
                    compute_dtype=None, tile_m_stats=8192, tile_m_norm=2048):
    """JAX/Pallas equivalent of TransitionDown.forward.

    pxo      : (p, x, o) with p:(N,3), x:(N,Cin), o:(B,) int32 offsets
    weight_t : (Cin, Cout)  linear weight, already transposed (y = x @ weight_t)
    gamma    : (Cout,)      BN weight
    beta     : (Cout,)      BN bias
    compute_dtype : optional streaming dtype (e.g. jnp.bfloat16) for x / weight_t;
                    accumulation and BN math remain f32.
    """
    p, x, o = pxo
    if stride != 1:
        # Strided slice (lax.slice with strides) -- no XLA gather materialization.
        p = p[::stride]
        x = x[::stride]

    if compute_dtype is not None and x.dtype != jnp.dtype(compute_dtype):
        x = x.astype(compute_dtype)
        weight_t = weight_t.astype(compute_dtype)

    M, Cin = x.shape
    Cout = weight_t.shape[1]
    out_dtype = x.dtype

    in_isz = jnp.dtype(x.dtype).itemsize
    w_isz = jnp.dtype(weight_t.dtype).itemsize
    out_isz = jnp.dtype(out_dtype).itemsize
    sub = _sublane(x.dtype)

    gamma2 = gamma.reshape(1, Cout).astype(jnp.float32)
    beta2 = beta.reshape(1, Cout).astype(jnp.float32)

    # VMEM footprint: double-buffered weight block + 1 MiB slack is "fixed";
    # the row-proportional part is the double-buffered x tile (+ output tile in phase 2).
    w_fixed = 2 * Cin * Cout * w_isz + (1 << 20)
    tm1 = _clamp_tm(tile_m_stats, M, 2 * Cin * in_isz, w_fixed, sub)
    tm2 = _clamp_tm(tile_m_norm, M, 2 * (Cin * in_isz + Cout * out_isz), w_fixed, sub)
    n1 = pl.cdiv(M, tm1)
    n2 = pl.cdiv(M, tm2)

    flops = 2 * M * Cin * Cout
    x_bytes = M * Cin * in_isz
    w_bytes = Cin * Cout * w_isz

    stats_cost = pl.CostEstimate(
        flops=flops, transcendentals=Cout,
        bytes_accessed=x_bytes + w_bytes + 4 * Cout * 4)
    norm_cost = pl.CostEstimate(
        flops=flops, transcendentals=0,
        bytes_accessed=x_bytes + w_bytes + M * Cout * out_isz)

    # ---- Phase 1: per-channel batch statistics -> (scale, shift) ----
    scale, shift = pl.pallas_call(
        functools.partial(_stats_kernel, m_total=M, tm=tm1, eps=_BN_EPS),
        out_shape=(jax.ShapeDtypeStruct((1, Cout), jnp.float32),
                   jax.ShapeDtypeStruct((1, Cout), jnp.float32)),
        grid=(n1,),
        in_specs=[
            pl.BlockSpec((tm1, Cin), lambda k: (k, 0)),    # x tile (streams over k)
            pl.BlockSpec((Cin, Cout), lambda k: (0, 0)),   # full weight (DMA'd once)
            pl.BlockSpec((1, Cout), lambda k: (0, 0)),     # gamma
            pl.BlockSpec((1, Cout), lambda k: (0, 0)),     # beta
        ],
        out_specs=(pl.BlockSpec((1, Cout), lambda k: (0, 0)),
                   pl.BlockSpec((1, Cout), lambda k: (0, 0))),
        scratch_shapes=[pltpu.VMEM((1, Cout), jnp.float32),   # sum accumulator
                        pltpu.VMEM((1, Cout), jnp.float32)],  # sum-of-squares
        compiler_params=pltpu.CompilerParams(
            dimension_semantics=("arbitrary",),
            vmem_limit_bytes=_VMEM_LIMIT_BYTES),
        cost_estimate=stats_cost,
    )(x, weight_t, gamma2, beta2)

    # ---- Phase 2: recompute matmul, fused affine + ReLU ----
    y = pl.pallas_call(
        _normalize_kernel,
        out_shape=jax.ShapeDtypeStruct((M, Cout), out_dtype),
        grid=(n2,),
        in_specs=[
            pl.BlockSpec((tm2, Cin), lambda k: (k, 0)),
            pl.BlockSpec((Cin, Cout), lambda k: (0, 0)),
            pl.BlockSpec((1, Cout), lambda k: (0, 0)),     # scale
            pl.BlockSpec((1, Cout), lambda k: (0, 0)),     # shift
        ],
        out_specs=pl.BlockSpec((tm2, Cout), lambda k: (k, 0)),
        compiler_params=pltpu.CompilerParams(
            dimension_semantics=("parallel",),
            vmem_limit_bytes=_VMEM_LIMIT_BYTES),
        cost_estimate=norm_cost,
    )(x, weight_t, scale, shift)

    return (p, y, o)


if __name__ == "__main__":
    # Small, deterministic config consistent with the module.
    N, Cin, Cout = 64, 16, 32
    stride, nsample = 2, 16

    key = jax.random.PRNGKey(0)
    k_p, k_x, k_w = jax.random.split(key, 3)

    p = jax.random.normal(k_p, (N, 3), dtype=jnp.float32)       # xyz coords
    x = jax.random.normal(k_x, (N, Cin), dtype=jnp.float32)     # features
    o = jnp.array([N], dtype=jnp.int32)                         # batch offsets

    # Parameters (nn.Linear(in, out, bias=False).weight is (Cout, Cin); store transpose).
    bound = 1.0 / (Cin ** 0.5)
    weight_t = jax.random.uniform(
        k_w, (Cin, Cout), dtype=jnp.float32, minval=-bound, maxval=bound)
    gamma = jnp.ones((Cout,), dtype=jnp.float32)   # BN default init
    beta = jnp.zeros((Cout,), dtype=jnp.float32)

    p_out, x_out, o_out = transition_down(
        (p, x, o), weight_t, gamma, beta, stride=stride, nsample=nsample)
    jax.block_until_ready(x_out)

    # Pure-JAX reference check (PyTorch forward semantics, training-mode BN).
    idx = jnp.arange(0, N, stride)
    xr = x[idx] @ weight_t
    mean = jnp.mean(xr, axis=0, keepdims=True)
    var = jnp.mean((xr - mean) ** 2, axis=0, keepdims=True)
    ref = jnp.maximum((xr - mean) / jnp.sqrt(var + _BN_EPS) * gamma + beta, 0.0)

    assert x_out.shape == (N // stride, Cout)
    assert p_out.shape == (N // stride, 3)
    assert jnp.allclose(x_out, ref, atol=1e-4, rtol=1e-4)

    print("KERNEL_OK")
</pallas_src>

<mosaic_0001>
module attributes {stable_mosaic.version = 11 : i64} {
  func.func @_stats_kernel(%arg0: i32, %arg1: memref<32x16xf32, #tpu.memory_space<vmem>>, %arg2: memref<16x32xf32, #tpu.memory_space<vmem>>, %arg3: memref<1x32xf32, #tpu.memory_space<vmem>>, %arg4: memref<1x32xf32, #tpu.memory_space<vmem>>, %arg5: memref<1x32xf32, #tpu.memory_space<vmem>>, %arg6: memref<1x32xf32, #tpu.memory_space<vmem>>, %arg7: memref<1x32xf32, #tpu.memory_space<vmem>>, %arg8: memref<1x32xf32, #tpu.memory_space<vmem>>) attributes {dimension_semantics = [#tpu.dimension_semantics<arbitrary>], iteration_bounds = array<i64: 1>, scalar_prefetch = 0 : i64, scratch_operands = 2 : i64, tpu.core_type = #tpu.core_type<tc>, window_params = [{transform_indices = @transform_0, window_bounds = array<i64: 32, 16>}, {pipeline_mode = #tpu.pipeline_mode<synchronous>, transform_indices = @transform_1, window_bounds = array<i64: 16, 32>}, {pipeline_mode = #tpu.pipeline_mode<synchronous>, transform_indices = @transform_2, window_bounds = array<i64: 1, 32>}, {pipeline_mode = #tpu.pipeline_mode<synchronous>, transform_indices = @transform_3, window_bounds = array<i64: 1, 32>}, {pipeline_mode = #tpu.pipeline_mode<synchronous>, transform_indices = @transform_4, window_bounds = array<i64: 1, 32>}, {pipeline_mode = #tpu.pipeline_mode<synchronous>, transform_indices = @transform_5, window_bounds = array<i64: 1, 32>}]} {
    %c0_i32 = arith.constant 0 : i32
    %0 = arith.cmpi eq, %arg0, %c0_i32 : i32
    %1 = arith.extui %0 : i1 to i32
    %c0_i32_0 = arith.constant 0 : i32
    %2 = arith.cmpi ne, %1, %c0_i32_0 : i32
    scf.if %2 {
      %cst_16 = arith.constant 0.000000e+00 : f32
      %20 = vector.broadcast %cst_16 : f32 to vector<1x32xf32>
      %c0_17 = arith.constant 0 : index
      %c0_18 = arith.constant 0 : index
      %21 = vector.load %arg7[%c0_17, %c0_18] : memref<1x32xf32, #tpu.memory_space<vmem>>, vector<1x32xf32>
      tpu.vector_store %arg7[%c0_17, %c0_18], %20 {strides = array<i32>} : memref<1x32xf32, #tpu.memory_space<vmem>>, vector<1x32xf32>,
      %cst_19 = arith.constant 0.000000e+00 : f32
      %22 = vector.broadcast %cst_19 : f32 to vector<1x32xf32>
      %c0_20 = arith.constant 0 : index
      %c0_21 = arith.constant 0 : index
      %23 = vector.load %arg8[%c0_20, %c0_21] : memref<1x32xf32, #tpu.memory_space<vmem>>, vector<1x32xf32>
      tpu.vector_store %arg8[%c0_20, %c0_21], %22 {strides = array<i32>} : memref<1x32xf32, #tpu.memory_space<vmem>>, vector<1x32xf32>,
    } else {
    }
    %c0 = arith.constant 0 : index
    %c0_1 = arith.constant 0 : index
    %3 = vector.load %arg1[%c0, %c0_1] : memref<32x16xf32, #tpu.memory_space<vmem>>, vector<32x16xf32>
    %c0_2 = arith.constant 0 : index
    %c0_3 = arith.constant 0 : index
    %4 = vector.load %arg2[%c0_2, %c0_3] : memref<16x32xf32, #tpu.memory_space<vmem>>, vector<16x32xf32>
    %cst = arith.constant dense<0.000000e+00> : vector<32x32xf32>
    %5 = tpu.matmul %3, %4, %cst {dimension_numbers = #tpu.dot_dimension_numbers<[1], [0], [0], [1], [0, 0, 1, 1], [], []>} : vector<32x16xf32>, vector<16x32xf32>, vector<32x32xf32> -> vector<32x32xf32>
    %c0_4 = arith.constant 0 : index
    %c0_5 = arith.constant 0 : index
    %6 = vector.load %arg7[%c0_4, %c0_5] : memref<1x32xf32, #tpu.memory_space<vmem>>, vector<1x32xf32>
    %cst_6 = arith.constant dense<0.000000e+00> : vector<32xf32>
    %7 = vector.multi_reduction <add>, %5, %cst_6 [0] : vector<32x32xf32> to vector<32xf32>
    %8 = vector.shape_cast %7 : vector<32xf32> to vector<1x32xf32>
    %9 = arith.addf %6, %8 : vector<1x32xf32>
    %c0_7 = arith.constant 0 : index
    %c0_8 = arith.constant 0 : index
    %10 = vector.load %arg7[%c0_7, %c0_8] : memref<1x32xf32, #tpu.memory_space<vmem>>, vector<1x32xf32>
    tpu.vector_store %arg7[%c0_7, %c0_8], %9 {strides = array<i32>} : memref<1x32xf32, #tpu.memory_space<vmem>>, vector<1x32xf32>,
    %c0_9 = arith.constant 0 : index
    %c0_10 = arith.constant 0 : index
    %11 = vector.load %arg8[%c0_9, %c0_10] : memref<1x32xf32, #tpu.memory_space<vmem>>, vector<1x32xf32>
    %12 = arith.mulf %5, %5 : vector<32x32xf32>
    %cst_11 = arith.constant dense<0.000000e+00> : vector<32xf32>
    %13 = vector.multi_reduction <add>, %12, %cst_11 [0] : vector<32x32xf32> to vector<32xf32>
    %14 = vector.shape_cast %13 : vector<32xf32> to vector<1x32xf32>
    %15 = arith.addf %11, %14 : vector<1x32xf32>
    %c0_12 = arith.constant 0 : index
    %c0_13 = arith.constant 0 : index
    %16 = vector.load %arg8[%c0_12, %c0_13] : memref<1x32xf32, #tpu.memory_space<vmem>>, vector<1x32xf32>
    tpu.vector_store %arg8[%c0_12, %c0_13], %15 {strides = array<i32>} : memref<1x32xf32, #tpu.memory_space<vmem>>, vector<1x32xf32>,
    %c0_i32_14 = arith.constant 0 : i32
    %17 = arith.cmpi eq, %arg0, %c0_i32_14 : i32
    %18 = arith.extui %17 : i1 to i32
    %c0_i32_15 = arith.constant 0 : i32
    %19 = arith.cmpi ne, %18, %c0_i32_15 : i32
    scf.if %19 {
      %c0_16 = arith.constant 0 : index
      %c0_17 = arith.constant 0 : index
      %20 = vector.load %arg7[%c0_16, %c0_17] : memref<1x32xf32, #tpu.memory_space<vmem>>, vector<1x32xf32>
      %cst_18 = arith.constant 3.125000e-02 : f32
      %21 = vector.broadcast %cst_18 : f32 to vector<1x32xf32>
      %22 = arith.mulf %20, %21 : vector<1x32xf32>
      %c0_19 = arith.constant 0 : index
      %c0_20 = arith.constant 0 : index
      %23 = vector.load %arg8[%c0_19, %c0_20] : memref<1x32xf32, #tpu.memory_space<vmem>>, vector<1x32xf32>
      %cst_21 = arith.constant 3.125000e-02 : f32
      %24 = vector.broadcast %cst_21 : f32 to vector<1x32xf32>
      %25 = arith.mulf %23, %24 : vector<1x32xf32>
      %26 = arith.mulf %22, %22 : vector<1x32xf32>
      %27 = arith.subf %25, %26 : vector<1x32xf32>
      %cst_22 = arith.constant 0.000000e+00 : f32
      %28 = vector.broadcast %cst_22 : f32 to vector<1x32xf32>
      %29 = arith.maximumf %27, %28 : vector<1x32xf32>
      %cst_23 = arith.constant 9.99999974E-6 : f32
      %30 = vector.broadcast %cst_23 : f32 to vector<1x32xf32>
      %31 = arith.addf %29, %30 : vector<1x32xf32>
      %32 = math.rsqrt %31 : vector<1x32xf32>
      %c0_24 = arith.constant 0 : index
      %c0_25 = arith.constant 0 : index
      %33 = vector.load %arg3[%c0_24, %c0_25] : memref<1x32xf32, #tpu.memory_space<vmem>>, vector<1x32xf32>
      %34 = arith.mulf %33, %32 : vector<1x32xf32>
      %c0_26 = arith.constant 0 : index
      %c0_27 = arith.constant 0 : index
      %35 = vector.load %arg5[%c0_26, %c0_27] : memref<1x32xf32, #tpu.memory_space<vmem>>, vector<1x32xf32>
      tpu.vector_store %arg5[%c0_26, %c0_27], %34 {strides = array<i32>} : memref<1x32xf32, #tpu.memory_space<vmem>>, vector<1x32xf32>,
      %c0_28 = arith.constant 0 : index
      %c0_29 = arith.constant 0 : index
      %36 = vector.load %arg4[%c0_28, %c0_29] : memref<1x32xf32, #tpu.memory_space<vmem>>, vector<1x32xf32>
      %37 = arith.mulf %22, %34 : vector<1x32xf32>
      %38 = arith.subf %36, %37 : vector<1x32xf32>
      %c0_30 = arith.constant 0 : index
      %c0_31 = arith.constant 0 : index
      %39 = vector.load %arg6[%c0_30, %c0_31] : memref<1x32xf32, #tpu.memory_space<vmem>>, vector<1x32xf32>
      tpu.vector_store %arg6[%c0_30, %c0_31], %38 {strides = array<i32>} : memref<1x32xf32, #tpu.memory_space<vmem>>, vector<1x32xf32>,
    } else {
    }
    return
  }
  func.func @transform_0(%arg0: i32) -> (i32, i32) {
    %c0_i32 = arith.constant 0 : i32
    %c0_i32_0 = arith.constant 0 : i32
    return %arg0, %c0_i32 : i32, i32
  }
  func.func @transform_1(%arg0: i32) -> (i32, i32) {
    %c0_i32 = arith.constant 0 : i32
    %c0_i32_0 = arith.constant 0 : i32
    %c0_i32_1 = arith.constant 0 : i32
    return %c0_i32, %c0_i32_0 : i32, i32
  }
  func.func @transform_2(%arg0: i32) -> (i32, i32) {
    %c0_i32 = arith.constant 0 : i32
    %c0_i32_0 = arith.constant 0 : i32
    %c0_i32_1 = arith.constant 0 : i32
    return %c0_i32, %c0_i32_0 : i32, i32
  }
  func.func @transform_3(%arg0: i32) -> (i32, i32) {
    %c0_i32 = arith.constant 0 : i32
    %c0_i32_0 = arith.constant 0 : i32
    %c0_i32_1 = arith.constant 0 : i32
    return %c0_i32, %c0_i32_0 : i32, i32
  }
  func.func @transform_4(%arg0: i32) -> (i32, i32) {
    %c0_i32 = arith.constant 0 : i32
    %c0_i32_0 = arith.constant 0 : i32
    %c0_i32_1 = arith.constant 0 : i32
    return %c0_i32, %c0_i32_0 : i32, i32
  }
  func.func @transform_5(%arg0: i32) -> (i32, i32) {
    %c0_i32 = arith.constant 0 : i32
    %c0_i32_0 = arith.constant 0 : i32
    %c0_i32_1 = arith.constant 0 : i32
    return %c0_i32, %c0_i32_0 : i32, i32
  }
}

</mosaic_0001>

<bundles_post_ra>
// kernel: tpu_custom_call.1
= control target key start
LH: loop header
LB: loop body
LE: loop exit
PB: predicated region body
PF: predicated region fallthrough
CT: control target
= control target key end

     0   :  { %11 = vsyncpa [#allocation5], 0  ;;  %vm34_vm0 = vcmask 130048   ;;  %s391_s0 = inlined_call_operand.vmem [shape: f32[32,16], index: 0, kind: input, shape index: {}]   ;;  %s392_s1 = inlined_call_operand.vmem [shape: f32[16,32], index: 1, kind: input, shape index: {}]   ;;  %s393_s2 = inlined_call_operand.vmem [shape: f32[1,32], index: 2, kind: input, shape index: {}]   ;;  %s394_s3 = inlined_call_operand.vmem [shape: f32[1,32], index: 3, kind: input, shape index: {}]   ;;  %s395_s4 = inlined_call_operand.hbm [shape: f32[1,32], index: 4, kind: output, shape index: {0}]   ;;  %s396_s5 = inlined_call_operand.hbm [shape: f32[1,32], index: 5, kind: output, shape index: {1}]  }
   0x1   :  { %v32_v0 = vld [vmem:[%s392_s1] sm:$0xff]  ;;  %v33_v1 = vld [vmem:[%s392_s1 + $0x8] sm:$0xff]  ;;  %v30_v4 = vld [vmem:[%s391_s0 + $0x10] sm:$0xff] }
   0x2   :  { %v28_v2 = vld [vmem:[%s391_s0] sm:$0xff]  ;;  %v237_v3 = vpack.c.bf16 %v33_v1, %v32_v0  ;;  %234 = vmatprep.mubr.msk.f32.mxu1 %vm34_vm0, %v30_v4 }
   0x3   :  { %231 = vmatprep.mubr.msk.f32.mxu0 %vm34_vm0, %v28_v2 }
   0x4   :  { %12 = vsyncpa [#allocation7], 0  ;;  %238 = vmatprep.subr.bf16.mxu0 %v237_v3  ;;  %241 = vmatprep.subr.bf16.mxu1 %v237_v3  ;;  %v29_v5 = vld [vmem:[%s391_s0 + $0x8] sm:$0xff]  ;;  %v31_v6 = vld [vmem:[%s391_s0 + $0x18] sm:$0xff]  ;;  %vm25_vm1 = vcmask 253952   ;;  %v296_v7 = vmov 0.0  }
   0x5   :  { %240 = vmatpush3.bf16.msra.mxu0 %v237_v3  ;;  %242 = vmatpush3.bf16.msra.mxu1 %v237_v3  ;;  %26 = vst.msk [vmem:[#allocation2] sm:$0x1] %vm25_vm1, %v296_v7  ;;  %27 = vst.msk [vmem:[#allocation3] sm:$0x1] %vm25_vm1, %v296_v7  ;;  %vm133_vm2 = vcmask 261120   ;;  %s297_s30 = smov [#allocation4]  }
   0x6   :  { %v182_v54 = vld [vmem:[%s393_s2] sm:$0x1]  ;;  %s195_s6 = sshll.u32 %s297_s30, 4  ;;  %s298_s9 = smov [#allocation6]   ;;  %s196_s6 = int_to_ptr.vmem [resolvable:$true] %s195_s6 }
   0x7   :  { %v185_v57 = vld [vmem:[%s394_s3] sm:$0x1]  ;;  %s205_s10 = sshll.u32 %s298_s9, 4  ;;  %s248_s11 = scalar_lea.vmem %s196_s6, 16  ;;  %s206_s10 = int_to_ptr.vmem [resolvable:$true] %s205_s10 }
   0x8   :  { %232 = vmatmul.mubr.msk.f32.vlgmr.msra.gmra.mrb[0].mxu0 %vm34_vm0, %v29_v5  ;;  %235 = vmatmul.mubr.msk.f32.vlgmr.msra.gmra.mrb[0].mxu1 %vm34_vm0, %v31_v6  ;;  %p249_p0 = scmp.ne.s32.totalorder %s196_s6, %s248_s11  ;;  %s252_s12 = scalar_lea.vmem %s196_s6, 32 }
   0x9   :  { %p253_p1 = scmp.lt.s32.totalorder %s196_s6, %s196_s6  ;;  %p254_p2 = scmp.lt.s32.totalorder %s252_s12, %s248_s11 }
   0xb   :  { %p255_p3 = por %p254_p2, %p253_p1 }
   0xc   :  { %v132_v39 = vld [vmem:[#allocation2] sm:$0x1]  ;;  %v150_v42 = vld [vmem:[#allocation3] sm:$0x1] }
   0xd   :  { %p256_p4 = pnand %p255_p3, %p249_p0 }
  0xdb   :  { %v233_v8 = vpop.f32.mrb[0].mxu0  ;;  %v236_v9 = vpop.f32.mrb[0].mxu1 }
  0xdc   :  { %v135_v10 = vsel %vm133_vm2, %v233_v8, 0.0  ;;  %v152_v11 = vmul.f32 %v233_v8, %v233_v8  ;;  %v113_v12 = vpop.f32.mrb[1].mxu0  ;;  %v123_v13 = vpop.f32.mrb[1].mxu1  ;;  %v154_v21 = vmul.f32 %v236_v9, %v236_v9  ;;  %v139_v25 = vsel %vm133_vm2, %v236_v9, 0.0 }
  0xdd   :  { %v134_v14 = vsel %vm133_vm2, %v113_v12, 0.0  ;;  %v151_v15 = vmul.f32 %v113_v12, %v113_v12  ;;  %v137_v16 = vsel %vm133_vm2, %v123_v13, 0.0  ;;  %v153_v17 = vmul.f32 %v123_v13, %v123_v13 }
  0xde   :  { %v156_v18 = vsel %vm133_vm2, %v152_v11, 0.0  ;;  %v136_v19 = vadd.f32 %v135_v10, %v134_v14  ;;  %v160_v28 = vsel %vm133_vm2, %v154_v21, 0.0 }
  0xdf   :  { %v155_v20 = vsel %vm133_vm2, %v151_v15, 0.0  ;;  %v158_v22 = vsel %vm133_vm2, %v153_v17, 0.0 }
  0xe0   :  { %v157_v23 = vadd.f32 %v156_v18, %v155_v20  ;;  %v138_v24 = vadd.f32 %v137_v16, %v136_v19 }
  0xe2   :  { %v140_v26 = vadd.f32 %v139_v25, %v138_v24  ;;  %v159_v27 = vadd.f32 %v158_v22, %v157_v23 }
  0xe4   :  { %v141_v29 = vrot.slane %v140_v26, 4  ;;  %v161_v30 = vadd.f32 %v160_v28, %v159_v27 }
  0xe6   :  { %v142_v31 = vadd.f32 %v141_v29, %v140_v26  ;;  %v162_v32 = vrot.slane %v161_v30, 4 }
  0xe8   :  { %v143_v33 = vrot.slane %v142_v31, 2  ;;  %v163_v34 = vadd.f32 %v162_v32, %v161_v30 }
  0xea   :  { %v144_v35 = vadd.f32 %v143_v33, %v142_v31  ;;  %v164_v36 = vrot.slane %v163_v34, 2 }
  0xec   :  { %v145_v37 = vrot.slane %v144_v35, 1  ;;  %v165_v38 = vadd.f32 %v164_v36, %v163_v34 }
  0xee   :  { %v146_v40 = vadd.f32 %v145_v37, %v144_v35  ;;  %v166_v41 = vrot.slane %v165_v38, 1 }
  0xf0   :  { %v167_v43 = vadd.f32 %v166_v41, %v165_v38  ;;  %v147_v44 = vadd.f32 %v146_v40, %v132_v39 }
  0xf2   :  { %149 = vst.msk [vmem:[#allocation2] sm:$0x1] %vm25_vm1, %v147_v44  ;;  %v168_v45 = vadd.f32 %v167_v43, %v150_v42 }
  0xf4   :  { %169 = vst.msk [vmem:[#allocation3] sm:$0x1] %vm25_vm1, %v168_v45 }
  0xf9   :  { %v173_v46 = vld [vmem:[#allocation2] sm:$0x1] }
  0xfa   :  { %v174_v47 = vmul.f32 0.03125, %v173_v46 }
  0xfb   :  { %v175_v48 = vld [vmem:[#allocation3] sm:$0x1] }
  0xfc   :  { %v176_v49 = vmul.f32 0.03125, %v175_v48  ;;  %v177_v50 = vmul.f32 %v174_v47, %v174_v47 }
  0xfe   :  { %v178_v51 = vsub.f32 %v176_v49, %v177_v50 }
 0x100   :  { %v179_v52 = vmax.f32 %v178_v51, 0.0 }
 0x102   :  { %v180_v53 = vadd.f32 1e-05, %v179_v52 }
 0x104   :  { %246 = vrsqrt.f32 %v180_v53 }
 0x10e   :  { %v247_v55 = vpop.eup %246 }
 0x10f   :  { %v183_v56 = vmul.f32 %v247_v55, %v182_v54 }
 0x111   :  { %184 = vst.msk [vmem:[#allocation4] sm:$0x1] %vm25_vm1, %v183_v56  ;;  %v186_v58 = vmul.f32 %v183_v56, %v174_v47 }
 0x112   :  { %259 = shalt.err (!%p256_p4)
}
 0x113   :  { %s260_s14 = scalar_lea.hbm %s395_s4, 16 }
 0x114   :  { %p261_p5 = scmp.ne.s32.totalorder %s395_s4, %s260_s14  ;;  %p264_p6 = scmp.lt.u32.totalorder %s260_s14, %s395_s4 }
 0x116   :  { %p266_p7 = pnand %p264_p6, %p261_p5 }
 0x118   :  { %269 = shalt.err (!%p266_p7)
}
 0x119   :  { %198 = dma.vmem_to_hbm [thread:$0]  %s196_s6, 16, %s395_s4, [#allocation5]   ;;  %v187_v59 = vsub.f32 %v185_v57, %v186_v58 }
 0x11a   :  { %s270_s20 = scalar_lea.vmem %s206_s10, 16  ;;  %s274_s21 = scalar_lea.vmem %s206_s10, 32 }
 0x11b   :  { %188 = vst.msk [vmem:[#allocation6] sm:$0x1] %vm25_vm1, %v187_v59  ;;  %p271_p8 = scmp.ne.s32.totalorder %s206_s10, %s270_s20  ;;  %p275_p9 = scmp.lt.s32.totalorder %s206_s10, %s206_s10 }
 0x11c   :  { %p276_p10 = scmp.lt.s32.totalorder %s274_s21, %s270_s20 }
 0x11e   :  { %p277_p11 = por %p276_p10, %p275_p9 }
 0x120   :  { %p278_p12 = pnand %p277_p11, %p271_p8 }
 0x122   :  { %281 = shalt.err (!%p278_p12)
}
 0x123   :  { %s282_s24 = scalar_lea.hbm %s396_s5, 16 }
 0x124   :  { %p283_p13 = scmp.ne.s32.totalorder %s396_s5, %s282_s24  ;;  %p286_p0 = scmp.lt.u32.totalorder %s282_s24, %s396_s5 }
 0x126   :  { %p288_p1 = pnand %p286_p0, %p283_p13 }
 0x128   :  { %291 = shalt.err (!%p288_p1)
}
 0x129   :  { %208 = dma.vmem_to_hbm [thread:$0]  %s206_s10, 16, %s396_s5, [#allocation7]  }
 0x12a   :  { %292 = dma.done.wait [#allocation5], 16  }
 0x12b   :  { %293 = vsyncadd [#allocation5], 4294967280 }
 0x12c   :  { %294 = dma.done.wait [#allocation7], 16  }
 0x12d   :  { %295 = vsyncadd [#allocation7], 4294967280 }
 0x12e   :  { %215 = vsyncpa [#allocation5], 1 }
 0x12f   :  { %216 = vsyncpa [#allocation7], 1 }

</bundles_post_ra>
